<compile_context>
chip_gen: v7x
topology: tpu7x:2x2x1
jax: 0.10.0
libtpu: 0.0.40
codegen_flags: <defaults>
</compile_context>

<pallas_src>
import functools
import math

import jax
import jax.numpy as jnp
from jax.experimental import pallas as pl
from jax.experimental.pallas import tpu as pltpu


# ---------------------------------------------------------------------------
# small static helpers (Python-time planning, no runtime cost)
# ---------------------------------------------------------------------------
def _round_up(x, m):
    return ((x + m - 1) // m) * m


def _cdiv(a, b):
    return -(-a // b)


@functools.lru_cache(maxsize=None)
def _budget():
    """Generation-aware VMEM budget (bytes) used for tiling and vmem_limit."""
    cap = 64 * 1024 * 1024
    try:
        info = pltpu.get_tpu_info()
        cap = int(getattr(info, "vmem_capacity_bytes", cap)) or cap
    except Exception:
        pass
    return max(32 * 1024 * 1024, (cap * 3) // 4)


def _pick_tk(K, max_tk=512):
    """K tile for the fallback path: multiple of 128 dividing K, else full K."""
    if K <= max_tk:
        return K
    for tk in range(max_tk - max_tk % 128, 127, -128):
        if K % tk == 0:
            return tk
    return K


def _plan_matmul(M, K, cout, has_res, budget):
    """Pick (tm, tn, tk, resident) for the BN-fused matmul."""
    tn = min(cout, 512)
    resident = (2 * K * tn * 2) <= budget // 3

    target = 1024 if budget >= 80 * (1 << 20) else 512
    tm = min(target, _round_up(M, 16))
    if tm >= 256:
        tm -= tm % 128

    def fits(t):
        per = (2 * t * K * 2              # A operand, double buffered, bf16
               + 2 * K * tn * 2           # resident weight block
               + 2 * t * tn * 2           # output block
               + (2 * t * tn * 2 if has_res else 0)
               + 2 * t * tn * 4           # f32 intermediates
               + 8 * tn * 4)              # BN scale / bias
        return per <= budget

    while tm > 16 and not fits(tm):
        nt = tm // 2
        tm = max(16, nt - nt % 16)
    if tm > M:
        tm = M                            # full-dim block is always legal

    # guarantee >=2 parallel output blocks where cheaply possible (v7x megacore)
    mb, nb = _cdiv(M, tm), _cdiv(cout, tn)
    if mb * nb < 2:
        if cout >= 256:
            tn = max(128, tn // 2)
        elif M >= 32:
            tm = _round_up(_cdiv(M, 2), 16)
            if tm > M:
                tm = M

    tk = K if resident else _pick_tk(K)
    return tm, tn, tk, resident


def _plan_conv3x3(R, Wp, cin, cout, budget):
    """Rows-of-image tile for the direct 3x3 stride-1 conv."""
    g = 8 // math.gcd(Wp, 8)              # tr*Wp must be a multiple of 8
    target_rows = 4096 if budget >= 80 * (1 << 20) else 2048
    tr = max(g, (target_rows // Wp) // g * g)
    tr = min(tr, _round_up(R, g))
    half = _round_up(_cdiv(R, 2), g)      # >=2 row blocks when possible
    tr = min(tr, max(g, half))

    def fits(t):
        rows = t * Wp
        per = (3 * 2 * rows * cin * 2     # 3 shifted A views, double buffered
               + 2 * 9 * cin * cout * 2   # resident weight
               + 2 * rows * cout * 2      # output block
               + 3 * rows * cout * 4      # f32 accumulator / tap products
               + 8 * cout * 4)
        return per <= budget

    while tr > g and not fits(tr):
        nt = tr // 2
        tr = max(g, nt - nt % g)
    if tr > R:
        tr = R
    return tr


# ---------------------------------------------------------------------------
# Pallas kernels
# ---------------------------------------------------------------------------
def _mm_single_kernel(*refs, relu, has_res):
    """Resident-weight matmul: (tm,K)@(K,tn) bf16 -> f32, BN(+res)(+ReLU), bf16."""
    if has_res:
        a_ref, b_ref, s_ref, c_ref, r_ref, o_ref = refs
    else:
        a_ref, b_ref, s_ref, c_ref, o_ref = refs
        r_ref = None
    y = jnp.dot(a_ref[...], b_ref[...], preferred_element_type=jnp.float32)
    y = y * s_ref[...] + c_ref[...]
    if has_res:
        y = y + r_ref[...].astype(jnp.float32)
    if relu:
        y = jnp.maximum(y, 0.0)
    o_ref[...] = y.astype(o_ref.dtype)


def _mm_ktiled_kernel(*refs, relu, has_res):
    """Fallback K-tiled matmul with VMEM f32 accumulator (reduction axis last)."""
    if has_res:
        a_ref, b_ref, s_ref, c_ref, id_ref, o_ref, acc_ref = refs
    else:
        a_ref, b_ref, s_ref, c_ref, o_ref, acc_ref = refs
        id_ref = None
    k = pl.program_id(2)

    @pl.when(k == 0)
    def _init():
        acc_ref[...] = jnp.zeros_like(acc_ref)

    acc_ref[...] += jnp.dot(a_ref[...], b_ref[...],
                            preferred_element_type=jnp.float32)

    @pl.when(k == pl.num_programs(2) - 1)
    def _epilogue():
        y = acc_ref[...] * s_ref[...] + c_ref[...]
        if has_res:
            y = y + id_ref[...].astype(jnp.float32)
        if relu:
            y = jnp.maximum(y, 0.0)
        o_ref[...] = y.astype(o_ref.dtype)


def _conv3x3_kernel(a0_ref, a1_ref, a2_ref, w_ref, s_ref, c_ref, o_ref, *,
                    cin, relu):
    """Direct 3x3 stride-1 conv on 3 H-shifted, W-padded views.

    Each A block is (tr*Wp, cin): tr whole image rows on the padded-width grid.
    The kw tap is a row shift inside the block (rows that wrap land only in the
    padded garbage columns, which are discarded by the wrapper).
    """
    a_refs = (a0_ref, a1_ref, a2_ref)
    acc = None
    for kh in range(3):
        a0 = a_refs[kh][...]
        for kw in range(3):
            if kw == 0:
                a = a0
            else:
                a = jnp.concatenate([a0[kw:], a0[:kw]], axis=0)
            wt = w_ref[(kh * 3 + kw) * cin:(kh * 3 + kw + 1) * cin, :]
            p = jnp.dot(a, wt, preferred_element_type=jnp.float32)
            acc = p if acc is None else acc + p
    y = acc * s_ref[...] + c_ref[...]
    if relu:
        y = jnp.maximum(y, 0.0)
    o_ref[...] = y.astype(o_ref.dtype)


def _max9_kernel(*refs):
    o_ref = refs[-1]
    m = refs[0][...]
    for r in refs[1:-1]:
        m = jnp.maximum(m, r[...])
    o_ref[...] = m


def _gap_kernel(x_ref, o_ref, *, inv_hw):
    t = pl.program_id(0)

    @pl.when(t == 0)
    def _():
        o_ref[...] = jnp.zeros_like(o_ref)

    o_ref[...] += jnp.sum(x_ref[...].astype(jnp.float32), axis=1)

    @pl.when(t == pl.num_programs(0) - 1)
    def _():
        o_ref[...] = o_ref[...] * inv_hw


# ---------------------------------------------------------------------------
# cached pallas_call builders
# ---------------------------------------------------------------------------
@functools.lru_cache(maxsize=None)
def _matmul_resident(M, K, cout, tm, tn, relu, has_res, budget):
    kernel = functools.partial(_mm_single_kernel, relu=relu, has_res=has_res)
    in_specs = [
        pl.BlockSpec((tm, K), lambda i, j: (i, 0)),     # A (bf16)
        pl.BlockSpec((K, tn), lambda i, j: (0, j)),     # resident weight (bf16)
        pl.BlockSpec((1, tn), lambda i, j: (0, j)),     # BN scale (f32)
        pl.BlockSpec((1, tn), lambda i, j: (0, j)),     # BN bias  (f32)
    ]
    if has_res:
        in_specs.append(pl.BlockSpec((tm, tn), lambda i, j: (i, j)))
    fn = pl.pallas_call(
        kernel,
        out_shape=jax.ShapeDtypeStruct((M, cout), jnp.bfloat16),
        grid=(_cdiv(M, tm), _cdiv(cout, tn)),
        in_specs=in_specs,
        out_specs=pl.BlockSpec((tm, tn), lambda i, j: (i, j)),
        compiler_params=pltpu.CompilerParams(
            dimension_semantics=("parallel", "parallel"),
            vmem_limit_bytes=budget),
    )
    return jax.jit(fn)


@functools.lru_cache(maxsize=None)
def _matmul_ktiled(M, K, cout, tm, tk, tn, relu, has_res, budget):
    kernel = functools.partial(_mm_ktiled_kernel, relu=relu, has_res=has_res)
    in_specs = [
        pl.BlockSpec((tm, tk), lambda i, j, k: (i, k)),
        pl.BlockSpec((tk, tn), lambda i, j, k: (k, j)),
        pl.BlockSpec((1, tn), lambda i, j, k: (0, j)),
        pl.BlockSpec((1, tn), lambda i, j, k: (0, j)),
    ]
    if has_res:
        in_specs.append(pl.BlockSpec((tm, tn), lambda i, j, k: (i, j)))
    fn = pl.pallas_call(
        kernel,
        out_shape=jax.ShapeDtypeStruct((M, cout), jnp.bfloat16),
        grid=(_cdiv(M, tm), _cdiv(cout, tn), K // tk),
        in_specs=in_specs,
        out_specs=pl.BlockSpec((tm, tn), lambda i, j, k: (i, j)),
        scratch_shapes=[pltpu.VMEM((tm, tn), jnp.float32)],
        compiler_params=pltpu.CompilerParams(
            dimension_semantics=("parallel", "parallel", "arbitrary"),
            vmem_limit_bytes=budget),
    )
    return jax.jit(fn)


@functools.lru_cache(maxsize=None)
def _conv3x3_resident(R, Wp, cin, cout, tr, relu, budget):
    rows_blk = tr * Wp
    kernel = functools.partial(_conv3x3_kernel, cin=cin, relu=relu)
    a_spec = pl.BlockSpec((rows_blk, cin), lambda i: (i, 0))
    fn = pl.pallas_call(
        kernel,
        out_shape=jax.ShapeDtypeStruct((R * Wp, cout), jnp.bfloat16),
        grid=(_cdiv(R, tr),),
        in_specs=[a_spec, a_spec, a_spec,
                  pl.BlockSpec((9 * cin, cout), lambda i: (0, 0)),
                  pl.BlockSpec((1, cout), lambda i: (0, 0)),
                  pl.BlockSpec((1, cout), lambda i: (0, 0))],
        out_specs=pl.BlockSpec((rows_blk, cout), lambda i: (i, 0)),
        compiler_params=pltpu.CompilerParams(
            dimension_semantics=("parallel",),
            vmem_limit_bytes=budget),
    )
    return jax.jit(fn)


@functools.lru_cache(maxsize=None)
def _max9(rows, cols, tr, budget):
    spec = pl.BlockSpec((tr, cols), lambda i: (i, 0))
    fn = pl.pallas_call(
        _max9_kernel,
        out_shape=jax.ShapeDtypeStruct((rows, cols), jnp.bfloat16),
        grid=(_cdiv(rows, tr),),
        in_specs=[spec] * 9,
        out_specs=spec,
        compiler_params=pltpu.CompilerParams(
            dimension_semantics=("parallel",),
            vmem_limit_bytes=budget),
    )
    return jax.jit(fn)


@functools.lru_cache(maxsize=None)
def _gap(n, hwp, c, thw, inv_hw, budget):
    kernel = functools.partial(_gap_kernel, inv_hw=inv_hw)
    fn = pl.pallas_call(
        kernel,
        out_shape=jax.ShapeDtypeStruct((n, c), jnp.float32),
        grid=(hwp // thw,),
        in_specs=[pl.BlockSpec((n, thw, c), lambda t: (0, t, 0))],
        out_specs=pl.BlockSpec((n, c), lambda t: (0, 0)),
        compiler_params=pltpu.CompilerParams(
            dimension_semantics=("arbitrary",),
            vmem_limit_bytes=budget),
    )
    return jax.jit(fn)


# ---------------------------------------------------------------------------
# JAX glue (layout plumbing only)
# ---------------------------------------------------------------------------
def _im2col(x, kh, kw, stride, padding):
    n, h, w, c = x.shape
    if padding > 0:
        x = jnp.pad(x, ((0, 0), (padding, padding), (padding, padding), (0, 0)))
    ho = (h + 2 * padding - kh) // stride + 1
    wo = (w + 2 * padding - kw) // stride + 1
    if kh == 1 and kw == 1:
        patches = x[:, 0:stride * ho:stride, 0:stride * wo:stride, :]
    else:
        cols = []
        for i in range(kh):
            for j in range(kw):
                cols.append(x[:, i:i + stride * ho:stride, j:j + stride * wo:stride, :])
        patches = jnp.concatenate(cols, axis=-1)   # feature order (kh, kw, cin)
    return patches.reshape(n * ho * wo, kh * kw * c), (n, ho, wo)


def _conv3x3_s1(x, w, bn_scale, bn_bias, *, relu):
    """Direct 3x3 stride-1 pad-1 conv: no im2col patch materialization."""
    n, h, wdt, cin = x.shape
    cout = w.shape[3]
    wp = wdt + 2
    budget = _budget()
    xp = jnp.pad(x, ((0, 0), (1, 1), (1, 1), (0, 0)))          # zero pad H,W
    views = tuple(
        xp[:, kh:kh + h, :, :].reshape(n * h * wp, cin) for kh in range(3))
    r = n * h
    tr = _plan_conv3x3(r, wp, cin, cout, budget)
    w2 = w.reshape(9 * cin, cout).astype(jnp.bfloat16)
    out = _conv3x3_resident(r, wp, cin, cout, tr, relu, budget)(
        views[0], views[1], views[2], w2,
        bn_scale.reshape(1, cout).astype(jnp.float32),
        bn_bias.reshape(1, cout).astype(jnp.float32))
    # drop the padded-width garbage columns
    return out.reshape(n, h, wp, cout)[:, :, :wdt, :]


def conv_bn_act(x, w, bn_scale, bn_bias, *, stride, padding, relu, residual=None):
    kh, kw, cin, cout = w.shape
    if kh == 3 and kw == 3 and stride == 1 and padding == 1 and residual is None:
        return _conv3x3_s1(x, w, bn_scale, bn_bias, relu=relu)

    patches, (n, ho, wo) = _im2col(x, kh, kw, stride, padding)
    M, K = patches.shape
    budget = _budget()
    has_res = residual is not None
    tm, tn, tk, resident = _plan_matmul(M, K, cout, has_res, budget)
    w2 = w.reshape(kh * kw * cin, cout).astype(jnp.bfloat16)
    args = [patches, w2,
            bn_scale.reshape(1, cout).astype(jnp.float32),
            bn_bias.reshape(1, cout).astype(jnp.float32)]
    if has_res:
        args.append(residual.reshape(M, cout).astype(jnp.bfloat16))
    if resident:
        out = _matmul_resident(M, K, cout, tm, tn, relu, has_res, budget)(*args)
    else:
        out = _matmul_ktiled(M, K, cout, tm, tk, tn, relu, has_res, budget)(*args)
    return out.reshape(n, ho, wo, cout)


def maxpool_3x3_s2_p1(x):
    n, h, w, c = x.shape
    budget = _budget()
    neg = jnp.asarray(float("-inf"), x.dtype)
    xp = jnp.pad(x, ((0, 0), (1, 1), (1, 1), (0, 0)), constant_values=neg)
    ho = (h - 1) // 2 + 1
    wo = (w - 1) // 2 + 1
    m = n * ho * wo
    views = [xp[:, i:i + 2 * ho:2, j:j + 2 * wo:2, :]
             for i in range(3) for j in range(3)]
    # lane-dense repack: 64-channel maps are folded to 128-wide rows so stores
    # are unmasked full-lane vst.
    if c % 128 == 0:
        rows, cols = m, c
    elif (m * c) % 128 == 0:
        rows, cols = (m * c) // 128, 128
    else:
        rows, cols = m, c
    views = [v.reshape(rows, cols) for v in views]
    tr = min(2048, _round_up(rows, 16))
    while tr > 16 and 10 * 2 * tr * cols * 2 > budget:
        tr //= 2
        tr -= tr % 16
    if tr > rows:
        tr = rows
    out = _max9(rows, cols, tr, budget)(*views)
    return out.reshape(n, ho, wo, c)


def global_avg_pool(x):
    n, h, w, c = x.shape
    hw = h * w
    budget = _budget()
    xr = x.reshape(n, hw, c)
    hwp = _round_up(hw, 8)
    if hwp != hw:
        xr = jnp.pad(xr, ((0, 0), (0, hwp - hw), (0, 0)))   # zeros: sum unchanged
    thw = hwp
    limit = budget // 4
    if n * hwp * c * 2 * 2 > limit:
        thw = 8
        for cand in range(min(hwp, 4096), 7, -8):
            if hwp % cand == 0 and n * cand * c * 2 * 2 <= limit:
                thw = cand
                break
    return _gap(n, hwp, c, thw, 1.0 / hw, budget)(xr)       # (N, C) float32


# ---------------------------------------------------------------------------
# Parameters (deterministic, synthetic)
# ---------------------------------------------------------------------------
def _make_conv(key, kh, kw, cin, cout):
    std = (2.0 / (kh * kw * cin)) ** 0.5
    w = std * jax.random.normal(key, (kh, kw, cin, cout), jnp.float32)
    return w.astype(jnp.bfloat16)


def _make_bn(key, c):
    k1, k2, k3, k4 = jax.random.split(key, 4)
    gamma = 1.0 + 0.1 * jax.random.normal(k1, (c,), jnp.float32)
    beta = 0.1 * jax.random.normal(k2, (c,), jnp.float32)
    mean = 0.1 * jax.random.normal(k3, (c,), jnp.float32)
    var = 0.5 + jax.random.uniform(k4, (c,), jnp.float32)
    scale = gamma * jax.lax.rsqrt(var + 1e-5)
    bias = beta - mean * scale
    return scale, bias


def build_resnet152_params(key):
    keys = iter(jax.random.split(key, 512))
    params = {
        "stem_w": _make_conv(next(keys), 7, 7, 3, 64),
        "stem_bn": _make_bn(next(keys), 64),
    }
    # ResNet-152: Bottleneck blocks [3, 8, 36, 3], widths [64,128,256,512], expansion 4.
    cfg = [(3, 64, 1), (8, 128, 2), (36, 256, 2), (3, 512, 2)]
    inplanes = 64
    layers = []
    for nblocks, width, stride in cfg:
        blocks = []
        for b in range(nblocks):
            s = stride if b == 0 else 1
            blk = {
                "stride": s,
                "conv1_w": _make_conv(next(keys), 1, 1, inplanes, width),
                "bn1": _make_bn(next(keys), width),
                "conv2_w": _make_conv(next(keys), 3, 3, width, width),
                "bn2": _make_bn(next(keys), width),
                "conv3_w": _make_conv(next(keys), 1, 1, width, width * 4),
                "bn3": _make_bn(next(keys), width * 4),
            }
            if b == 0:
                blk["down_w"] = _make_conv(next(keys), 1, 1, inplanes, width * 4)
                blk["down_bn"] = _make_bn(next(keys), width * 4)
            else:
                blk["down_w"] = None
                blk["down_bn"] = None
            blocks.append(blk)
            inplanes = width * 4
        layers.append(blocks)
    params["layers"] = layers
    return params


# ---------------------------------------------------------------------------
# Forward pass (ResNetEncoder.forward semantics)
# ---------------------------------------------------------------------------
def _bottleneck(x, blk):
    s = blk["stride"]
    out = conv_bn_act(x, blk["conv1_w"], *blk["bn1"], stride=1, padding=0, relu=True)
    out = conv_bn_act(out, blk["conv2_w"], *blk["bn2"], stride=s, padding=1, relu=True)
    if blk["down_w"] is not None:
        identity = conv_bn_act(x, blk["down_w"], *blk["down_bn"],
                               stride=s, padding=0, relu=False)
    else:
        identity = x
    # conv3 + bn3 + residual add + ReLU fused into a single matmul epilogue.
    out = conv_bn_act(out, blk["conv3_w"], *blk["bn3"],
                      stride=1, padding=0, relu=True, residual=identity)
    return out


def resnet152_encoder_forward(params, x_nchw):
    # PyTorch gives NCHW; convert once to NHWC bf16 for the TPU-friendly layout.
    x = jnp.transpose(x_nchw, (0, 2, 3, 1)).astype(jnp.bfloat16)
    x = conv_bn_act(x, params["stem_w"], *params["stem_bn"],
                    stride=2, padding=3, relu=True)          # conv1+bn1+relu
    x = maxpool_3x3_s2_p1(x)                                  # maxpool
    for stage in params["layers"]:                            # layer1..layer4
        for blk in stage:
            x = _bottleneck(x, blk)
    feat = global_avg_pool(x)                                 # AdaptiveAvgPool2d((1,1))
    return feat                                               # x.view(x.size(0), -1) -> (N, 2048)


# ---------------------------------------------------------------------------
if __name__ == "__main__":
    key = jax.random.PRNGKey(0)
    pkey, xkey = jax.random.split(key)
    params = build_resnet152_params(pkey)
    # Small deterministic input, NCHW like PyTorch: batch=2, 3 channels, 64x64.
    x = jax.random.normal(xkey, (2, 3, 64, 64), jnp.float32)
    feats = resnet152_encoder_forward(params, x)
    feats = jax.block_until_ready(feats)
    assert feats.shape == (2, 2048), feats.shape
    assert bool(jnp.all(jnp.isfinite(feats)))
    print("KERNEL_OK")
</pallas_src>

<mosaic_0001>
module attributes {stable_mosaic.version = 11 : i64} {
  func.func @_mm_single_kernel(%arg0: i32, %arg1: i32, %arg2: memref<512x147xbf16, #tpu.memory_space<vmem>>, %arg3: memref<147x64xbf16, #tpu.memory_space<vmem>>, %arg4: memref<1x64xf32, #tpu.memory_space<vmem>>, %arg5: memref<1x64xf32, #tpu.memory_space<vmem>>, %arg6: memref<512x64xbf16, #tpu.memory_space<vmem>>) attributes {dimension_semantics = [#tpu.dimension_semantics<parallel>, #tpu.dimension_semantics<parallel>], iteration_bounds = array<i64: 4, 1>, scalar_prefetch = 0 : i64, scratch_operands = 0 : i64, tpu.core_type = #tpu.core_type<tc>, window_params = [{transform_indices = @transform_0, window_bounds = array<i64: 512, 147>}, {transform_indices = @transform_1, window_bounds = array<i64: 147, 64>}, {transform_indices = @transform_2, window_bounds = array<i64: 1, 64>}, {transform_indices = @transform_3, window_bounds = array<i64: 1, 64>}, {transform_indices = @transform_4, window_bounds = array<i64: 512, 64>}]} {
    %c0 = arith.constant 0 : index
    %c0_0 = arith.constant 0 : index
    %0 = vector.load %arg2[%c0, %c0_0] : memref<512x147xbf16, #tpu.memory_space<vmem>>, vector<512x147xbf16>
    %c0_1 = arith.constant 0 : index
    %c0_2 = arith.constant 0 : index
    %1 = vector.load %arg3[%c0_1, %c0_2] : memref<147x64xbf16, #tpu.memory_space<vmem>>, vector<147x64xbf16>
    %cst = arith.constant dense<0.000000e+00> : vector<512x64xf32>
    %2 = tpu.matmul %0, %1, %cst {dimension_numbers = #tpu.dot_dimension_numbers<[1], [0], [0], [1], [0, 0, 1, 1], [], []>} : vector<512x147xbf16>, vector<147x64xbf16>, vector<512x64xf32> -> vector<512x64xf32>
    %c0_3 = arith.constant 0 : index
    %c0_4 = arith.constant 0 : index
    %3 = vector.load %arg4[%c0_3, %c0_4] : memref<1x64xf32, #tpu.memory_space<vmem>>, vector<1x64xf32>
    %4 = vector.broadcast %3 : vector<1x64xf32> to vector<512x64xf32>
    %5 = arith.mulf %2, %4 : vector<512x64xf32>
    %c0_5 = arith.constant 0 : index
    %c0_6 = arith.constant 0 : index
    %6 = vector.load %arg5[%c0_5, %c0_6] : memref<1x64xf32, #tpu.memory_space<vmem>>, vector<1x64xf32>
    %7 = vector.broadcast %6 : vector<1x64xf32> to vector<512x64xf32>
    %8 = arith.addf %5, %7 : vector<512x64xf32>
    %cst_7 = arith.constant 0.000000e+00 : f32
    %9 = vector.broadcast %cst_7 : f32 to vector<512x64xf32>
    %10 = arith.maximumf %8, %9 : vector<512x64xf32>
    %11 = arith.truncf %10 : vector<512x64xf32> to vector<512x64xbf16>
    %c0_8 = arith.constant 0 : index
    %c0_9 = arith.constant 0 : index
    %12 = vector.load %arg6[%c0_8, %c0_9] : memref<512x64xbf16, #tpu.memory_space<vmem>>, vector<512x64xbf16>
    tpu.vector_store %arg6[%c0_8, %c0_9], %11 {strides = array<i32>} : memref<512x64xbf16, #tpu.memory_space<vmem>>, vector<512x64xbf16>,
    return
  }
  func.func @transform_0(%arg0: i32, %arg1: i32) -> (i32, i32) {
    %c0_i32 = arith.constant 0 : i32
    %c0_i32_0 = arith.constant 0 : i32
    return %arg0, %c0_i32 : i32, i32
  }
  func.func @transform_1(%arg0: i32, %arg1: i32) -> (i32, i32) {
    %c0_i32 = arith.constant 0 : i32
    %c0_i32_0 = arith.constant 0 : i32
    return %c0_i32, %arg1 : i32, i32
  }
  func.func @transform_2(%arg0: i32, %arg1: i32) -> (i32, i32) {
    %c0_i32 = arith.constant 0 : i32
    %c0_i32_0 = arith.constant 0 : i32
    return %c0_i32, %arg1 : i32, i32
  }
  func.func @transform_3(%arg0: i32, %arg1: i32) -> (i32, i32) {
    %c0_i32 = arith.constant 0 : i32
    %c0_i32_0 = arith.constant 0 : i32
    return %c0_i32, %arg1 : i32, i32
  }
  func.func @transform_4(%arg0: i32, %arg1: i32) -> (i32, i32) {
    %c0_i32 = arith.constant 0 : i32
    return %arg0, %arg1 : i32, i32
  }
}

</mosaic_0001>

<bundles_post_ra>
// kernel: tpu_custom_call.1
= control target key start
LH: loop header
LB: loop body
LE: loop exit
PB: predicated region body
PF: predicated region fallthrough
CT: control target
= control target key end

     0   :  { %s2187_s15 = smov 0   ;;  %s2189_s16 = smov 0   ;;  %s2620_s0 = inlined_call_operand.vmem [shape: bf16[2048,147], index: 0, kind: input, shape index: {}]   ;;  %s2621_s1 = inlined_call_operand.vmem [shape: bf16[147,64], index: 1, kind: input, shape index: {}]   ;;  %s2622_s2 = inlined_call_operand.vmem [shape: f32[1,64], index: 2, kind: input, shape index: {}]   ;;  %s2623_s3 = inlined_call_operand.vmem [shape: f32[1,64], index: 3, kind: input, shape index: {}]   ;;  %s2624_s4 = inlined_call_operand.vmem [shape: bf16[2048,64], index: 4, kind: output, shape index: {}]  }
   0x1   :  { %s2191_s17 = smov 0  }
   0x2 LB: > { %s26_s18 = sadd.s32 1, %s2154_s16  ;;  %p1739_p0 = scmp.ge.s32.totalorder %s2158_s17, 1  ;;  %s2158_s17 = sphi %s2191_s17, %s14_s17   ;;  %s2154_s16 = sphi %s2189_s16, %s2626_s16   ;;  %s2150_s15 = sphi %s2187_s15, %s2625_s15  }
   0x3   : > { %p28_p1 = scmp.ge.s32.totalorder %s26_s18, 4  ;;  %p203_p2 = scmp.lt.s32.totalorder %s2158_s17, 5 }
   0x5   : > { %s2628_s18 = smov (%p28_p1, %s26_s18), 0  ;;  %p204_p3 = pnand %p1739_p0, %p203_p2 }
   0x6   : > { %v2030_v0 = vld [vmem:[%s2621_s1] sm:$0xff] (!%p204_p3)   ;;  %v2160_v1 = vmov (!%p204_p3), 0   ;;  %v2031_v2 = vld [vmem:[%s2621_s1 + $0x8] sm:$0xff] (!%p204_p3)   ;;  %v2032_v3 = vld [vmem:[%s2621_s1 + $0x10] sm:$0xff] (!%p204_p3)   ;;  %s1740_s25 = sshll.u32 (!%p204_p3), %s2150_s15, 6  ;;  %vm698_vm0 = vcmask (!%p204_p3), 154624  }
   0x7   : > { %207 = sbr.rel (%p204_p3) target bundleno = 390 (0x186), region = 36  ;;  %802 = vmatprep.subr.bf16.mxu0 (!%p204_p3), %v2160_v1  ;;  %1984 = vmatprep.subr.bf16.mxu1 (!%p204_p3), %v2160_v1  ;;  %p244_p4 = scmp.lt.s32.totalorder (!%p204_p3), %s1740_s25, 255  ;;  %v2033_v4 = vld [vmem:[%s2621_s1 + $0x18] sm:$0xff] (!%p204_p3)   ;;  %v2034_v5 = vld [vmem:[%s2621_s1 + $0x20] sm:$0xff] (!%p204_p3)   ;;  %v2035_v8 = vld [vmem:[%s2621_s1 + $0x28] sm:$0xff] (!%p204_p3)   ;;  %vm795_vm1 = vcmask (!%p204_p3), 1040384  }
   0x8   : > { %803 = vmatpush1.bf16.msra.mxu0 (!%p204_p3), %v2030_v0  ;;  %1994 = vmatpush1.bf16.msra.mxu1 (!%p204_p3), %v2030_v0  ;;  %v2036_v9 = vld [vmem:[%s2621_s1 + $0x30] sm:$0xff] (!%p204_p3)   ;;  %v2037_v10 = vld [vmem:[%s2621_s1 + $0x38] sm:$0xff] (!%p204_p3)   ;;  %vm796_vm2 = vcmask (!%p204_p3), 1041408   ;;  %v2161_v11 = vmov (!%p204_p3), 65535   ;;  %v2038_v13 = vld [vmem:[%s2621_s1 + $0x40] sm:$0xff] (!%p204_p3)   ;;  %vm1553_vm3 = vcmask (!%p204_p3), 519168  }
   0x9   : > { %804 = vmatprep.subr.bf16.mxu0 (!%p204_p3), %v2160_v1  ;;  %1985 = vmatprep.subr.bf16.mxu1 (!%p204_p3), %v2160_v1  ;;  %v797_v12 = vsel (!%p204_p3), %vm795_vm1, 4294967295, %v2161_v11  ;;  %v2039_v14 = vld [vmem:[%s2621_s1 + $0x48] ss:$0 sps:$4 sm:$0x33] (!%p204_p3)  }
   0xa   : > { %v798_v15 = vsel (!%p204_p3), %vm796_vm2, %v797_v12, 0 }
   0xb   : > { %v800_v16 = vand.u32 (!%p204_p3), %v2039_v14, %v798_v15  ;;  %v2342_v15 = vld [vmem:[%s2622_s2] ss:$0 sm:$0xff] (!%p204_p3) }
   0xc   : > { %805 = vmatpush1.bf16.msra.mxu0 (!%p204_p3), %v2031_v2  ;;  %1995 = vmatpush1.bf16.msra.mxu1 (!%p204_p3), %v2031_v2 }
   0xd   : > { %806 = vmatprep.subr.bf16.mxu0 (!%p204_p3), %v2160_v1  ;;  %1986 = vmatprep.subr.bf16.mxu1 (!%p204_p3), %v2160_v1 }
   0xe   : > { %s2630_s25 = smov (!%p244_p4, %s1740_s25), 255 }
   0xf   : > { %s1919_s28 = sshll.u32 %s2630_s25, 3  ;;  %s1744_s26 = sshll.u32 %s2630_s25, 2 }
  0x10   : > { %807 = vmatpush1.bf16.msra.mxu0 %v2032_v3  ;;  %1996 = vmatpush1.bf16.msra.mxu1 %v2032_v3  ;;  %s2223_s5 = scalar_lea.vmem %s2620_s0, %s1919_s28  ;;  %s2361_s25 = scalar_lea.vmem %s2624_s4, %s1744_s26 }
  0x11   : > { %808 = vmatprep.subr.bf16.mxu0 %v2160_v1  ;;  %1987 = vmatprep.subr.bf16.mxu1 %v2160_v1  ;;  %v2042_v6 = vld [vmem:[%s2223_s5 + $0x4] ss:$8 sps:$4 sm:$0xff]   ;;  %v2040_v17 = vld [vmem:[%s2223_s5] ss:$8 sps:$4 sm:$0xff]   ;;  %v2046_v19 = vld [vmem:[%s2223_s5 + $0x14] ss:$8 sps:$4 sm:$0xff]  }
  0x12   : > { %v2045_v7 = vld [vmem:[%s2223_s5 + $0x104] ss:$8 sps:$4 sm:$0xff]   ;;  %1819 = vmatprep.mubr.msk.bf16.mxu0 %vm698_vm0, %v2042_v6  ;;  %v2043_v18 = vld [vmem:[%s2223_s5 + $0x100] ss:$8 sps:$4 sm:$0xff]   ;;  %v2048_v20 = vld [vmem:[%s2223_s5 + $0x114] ss:$8 sps:$4 sm:$0xff]  }
  0x13   : > { %1835 = vmatprep.mubr.msk.bf16.mxu1 %vm698_vm0, %v2045_v7  ;;  %v2050_v21 = vld [vmem:[%s2223_s5 + $0x10] ss:$8 sps:$4 sm:$0xff]   ;;  %v2052_v23 = vld [vmem:[%s2223_s5 + $0x24] ss:$8 sps:$4 sm:$0xff]   ;;  %v2056_v25 = vld [vmem:[%s2223_s5 + $0x20] ss:$8 sps:$4 sm:$0xff]  }
  0x14   : > { %809 = vmatpush1.bf16.msra.mxu0 %v2033_v4  ;;  %1997 = vmatpush1.bf16.msra.mxu1 %v2033_v4  ;;  %v2051_v22 = vld [vmem:[%s2223_s5 + $0x110] ss:$8 sps:$4 sm:$0xff]   ;;  %v2054_v24 = vld [vmem:[%s2223_s5 + $0x124] ss:$8 sps:$4 sm:$0xff]   ;;  %v2057_v26 = vld [vmem:[%s2223_s5 + $0x120] ss:$8 sps:$4 sm:$0xff]  }
  0x15   : > { %810 = vmatprep.subr.bf16.mxu0 %v2160_v1  ;;  %1988 = vmatprep.subr.bf16.mxu1 %v2160_v1  ;;  %v2058_v27 = vld [vmem:[%s2223_s5 + $0x34] ss:$8 sps:$4 sm:$0xff]   ;;  %v2062_v29 = vld [vmem:[%s2223_s5 + $0x30] ss:$8 sps:$4 sm:$0xff]   ;;  %v2064_v31 = vld [vmem:[%s2223_s5 + $0x44] ss:$8 sps:$4 sm:$0xff]  }
  0x16   : > { %v2060_v28 = vld [vmem:[%s2223_s5 + $0x134] ss:$8 sps:$4 sm:$0xff]   ;;  %v2063_v30 = vld [vmem:[%s2223_s5 + $0x130] ss:$8 sps:$4 sm:$0xff]   ;;  %v2066_v32 = vld [vmem:[%s2223_s5 + $0x144] ss:$8 sps:$4 sm:$0xff]  }
  0x17   : > { %v2068_v33 = vld [vmem:[%s2223_s5 + $0x40] ss:$8 sps:$4 sm:$0xff]   ;;  %v2070_v35 = vld [vmem:[%s2223_s5 + $0x54] ss:$8 sps:$4 sm:$0xff]   ;;  %v2074_v37 = vld [vmem:[%s2223_s5 + $0x50] ss:$8 sps:$4 sm:$0xff]  }
  0x18   : > { %811 = vmatpush1.bf16.msra.mxu0 %v2034_v5  ;;  %1998 = vmatpush1.bf16.msra.mxu1 %v2034_v5  ;;  %v2069_v34 = vld [vmem:[%s2223_s5 + $0x140] ss:$8 sps:$4 sm:$0xff]   ;;  %v2072_v36 = vld [vmem:[%s2223_s5 + $0x154] ss:$8 sps:$4 sm:$0xff]   ;;  %v2075_v38 = vld [vmem:[%s2223_s5 + $0x150] ss:$8 sps:$4 sm:$0xff]  }
  0x19   : > { %812 = vmatprep.subr.bf16.mxu0 %v2160_v1  ;;  %1989 = vmatprep.subr.bf16.mxu1 %v2160_v1  ;;  %v2076_v39 = vld [vmem:[%s2223_s5 + $0x64] ss:$8 sps:$4 sm:$0xff]   ;;  %v2080_v41 = vld [vmem:[%s2223_s5 + $0x60] ss:$8 sps:$4 sm:$0xff]   ;;  %v2082_v43 = vld [vmem:[%s2223_s5 + $0x74] ss:$8 sps:$4 sm:$0xff]  }
  0x1a   : > { %v2078_v40 = vld [vmem:[%s2223_s5 + $0x164] ss:$8 sps:$4 sm:$0xff]   ;;  %v2081_v42 = vld [vmem:[%s2223_s5 + $0x160] ss:$8 sps:$4 sm:$0xff]   ;;  %v2084_v44 = vld [vmem:[%s2223_s5 + $0x174] ss:$8 sps:$4 sm:$0xff]  }
  0x1b   : > { %v2086_v45 = vld [vmem:[%s2223_s5 + $0x70] ss:$8 sps:$4 sm:$0xff]   ;;  %v2088_v47 = vld [vmem:[%s2223_s5 + $0x84] ss:$8 sps:$4 sm:$0xff]   ;;  %v2092_v49 = vld [vmem:[%s2223_s5 + $0x80] ss:$8 sps:$4 sm:$0xff]  }
  0x1c   : > { %813 = vmatpush1.bf16.msra.mxu0 %v2035_v8  ;;  %1999 = vmatpush1.bf16.msra.mxu1 %v2035_v8  ;;  %v2087_v46 = vld [vmem:[%s2223_s5 + $0x170] ss:$8 sps:$4 sm:$0xff]   ;;  %v2090_v48 = vld [vmem:[%s2223_s5 + $0x184] ss:$8 sps:$4 sm:$0xff]   ;;  %v2093_v50 = vld [vmem:[%s2223_s5 + $0x180] ss:$8 sps:$4 sm:$0xff]  }
  0x1d   : > { %814 = vmatprep.subr.bf16.mxu0 %v2160_v1  ;;  %1990 = vmatprep.subr.bf16.mxu1 %v2160_v1  ;;  %v2094_v51 = vld [vmem:[%s2223_s5 + $0x94] ss:$8 sps:$4 sm:$0xff]   ;;  %v2098_v53 = vld [vmem:[%s2223_s5 + $0x90] ss:$8 sps:$4 sm:$0xff]   ;;  %v2100_v55 = vld [vmem:[%s2223_s5 + $0xa4] ss:$8 sps:$4 sm:$0xff]  }
  0x1e   : > { %v2096_v52 = vld [vmem:[%s2223_s5 + $0x194] ss:$8 sps:$4 sm:$0xff]   ;;  %v2099_v54 = vld [vmem:[%s2223_s5 + $0x190] ss:$8 sps:$4 sm:$0xff]   ;;  %v2102_v56 = vld [vmem:[%s2223_s5 + $0x1a4] ss:$8 sps:$4 sm:$0xff]  }
  0x1f   : > { %v2104_v57 = vld [vmem:[%s2223_s5 + $0xa0] ss:$8 sps:$4 sm:$0xff]   ;;  %v2106_v59 = vld [vmem:[%s2223_s5 + $0xb4] ss:$8 sps:$4 sm:$0xff]   ;;  %v2110_v61 = vld [vmem:[%s2223_s5 + $0xb0] ss:$8 sps:$4 sm:$0xff]  }
  0x20   : > { %815 = vmatpush1.bf16.msra.mxu0 %v2036_v9  ;;  %2000 = vmatpush1.bf16.msra.mxu1 %v2036_v9  ;;  %v2105_v58 = vld [vmem:[%s2223_s5 + $0x1a0] ss:$8 sps:$4 sm:$0xff]   ;;  %v2108_v60 = vld [vmem:[%s2223_s5 + $0x1b4] ss:$8 sps:$4 sm:$0xff]   ;;  %v2111_v62 = vld [vmem:[%s2223_s5 + $0x1b0] ss:$8 sps:$4 sm:$0xff]  }
  0x21   : > { %816 = vmatprep.subr.bf16.mxu0 %v2160_v1  ;;  %1991 = vmatprep.subr.bf16.mxu1 %v2160_v1  ;;  %v2112_v63 = vld [vmem:[%s2223_s5 + $0xc4] ss:$8 sps:$4 sm:$0xff]   ;;  %v2117_v2 = vld [vmem:[%s2223_s5 + $0x1c0] ss:$8 sps:$4 sm:$0xff]   ;;  %v2118_v3 = vld [vmem:[%s2223_s5 + $0xd4] ss:$8 sps:$4 sm:$0xff]  }
  0x22   : > { %v2114_v0 = vld [vmem:[%s2223_s5 + $0x1c4] ss:$8 sps:$4 sm:$0xff]   ;;  %v2120_v4 = vld [vmem:[%s2223_s5 + $0x1d4] ss:$8 sps:$4 sm:$0xff]   ;;  %v2122_v5 = vld [vmem:[%s2223_s5 + $0xd0] ss:$8 sps:$4 sm:$0xff]  }
  0x23   : > { %v2123_v6 = vld [vmem:[%s2223_s5 + $0x1d0] ss:$8 sps:$4 sm:$0xff]   ;;  %v2124_v7 = vld [vmem:[%s2223_s5 + $0xe4] ss:$8 sps:$4 sm:$0xff]   ;;  %v2128_v9 = vld [vmem:[%s2223_s5 + $0xe0] ss:$8 sps:$4 sm:$0xff]  }
  0x24   : > { %817 = vmatpush1.bf16.msra.mxu0 %v2037_v10  ;;  %2001 = vmatpush1.bf16.msra.mxu1 %v2037_v10  ;;  %v2126_v8 = vld [vmem:[%s2223_s5 + $0x1e4] ss:$8 sps:$4 sm:$0xff]   ;;  %v2129_v10 = vld [vmem:[%s2223_s5 + $0x1e0] ss:$8 sps:$4 sm:$0xff]   ;;  %v2130_v11 = vld [vmem:[%s2223_s5 + $0xf4] ss:$8 sps:$4 sm:$0xff]  }
  0x25   : > { %818 = vmatprep.subr.bf16.mxu0 %v2160_v1  ;;  %1992 = vmatprep.subr.bf16.mxu1 %v2160_v1  ;;  %v2132_v12 = vld [vmem:[%s2223_s5 + $0x1f4] ss:$8 sps:$4 sm:$0xff]   ;;  %v2135_v14 = vld [vmem:[%s2223_s5 + $0x1f0] ss:$8 sps:$4 sm:$0xff]  }
  0x28   : > { %819 = vmatpush1.bf16.msra.mxu0 %v2038_v13  ;;  %2002 = vmatpush1.bf16.msra.mxu1 %v2038_v13  ;;  %v2134_v13 = vld [vmem:[%s2223_s5 + $0xf0] ss:$8 sps:$4 sm:$0xff]  }
  0x29   : > { %820 = vmatprep.subr.bf16.mxu0 %v2160_v1  ;;  %1993 = vmatprep.subr.bf16.mxu1 %v2160_v1  ;;  %v2116_v1 = vld [vmem:[%s2223_s5 + $0xc0] ss:$8 sps:$4 sm:$0xff]  }
  0x2c   : > { %821 = vmatpush1.bf16.msra.mxu0 %v800_v16  ;;  %2003 = vmatpush1.bf16.msra.mxu1 %v800_v16 }
  0x2f   : > { %835 = vmatmul.mubr.bf16.vlgmr.msra.gmra.mrb[0].mxu0 %v2040_v17  ;;  %963 = vmatmul.mubr.bf16.vlgmr.msra.gmra.mrb[0].mxu1 %v2043_v18  ;;  %v2347_v17 = vld [vmem:[%s2623_s3] ss:$0 sm:$0xff] }
  0x30   : > { %1820 = vmatprep.mubr.msk.bf16.mxu0 %vm698_vm0, %v2046_v19  ;;  %1836 = vmatprep.mubr.msk.bf16.mxu1 %vm698_vm0, %v2048_v20 }
  0x37   : > { %843 = vmatmul.mubr.bf16.gmra.mrb[4].mxu0 %v2050_v21  ;;  %971 = vmatmul.mubr.bf16.gmra.mrb[4].mxu1 %v2051_v22 }
  0x38   : > { %1821 = vmatprep.mubr.msk.bf16.mxu0 %vm698_vm0, %v2052_v23  ;;  %1837 = vmatprep.mubr.msk.bf16.mxu1 %vm698_vm0, %v2054_v24 }
  0x3f   : > { %851 = vmatmul.mubr.bf16.gmra.mrb[8].mxu0 %v2056_v25  ;;  %979 = vmatmul.mubr.bf16.gmra.mrb[8].mxu1 %v2057_v26 }
  0x40   : > { %1822 = vmatprep.mubr.msk.bf16.mxu0 %vm698_vm0, %v2058_v27  ;;  %1838 = vmatprep.mubr.msk.bf16.mxu1 %vm698_vm0, %v2060_v28 }
  0x47   : > { %859 = vmatmul.mubr.bf16.gmra.mrb[12].mxu0 %v2062_v29  ;;  %987 = vmatmul.mubr.bf16.gmra.mrb[12].mxu1 %v2063_v30 }
  0x48   : > { %1823 = vmatprep.mubr.msk.bf16.mxu0 %vm698_vm0, %v2064_v31  ;;  %1839 = vmatprep.mubr.msk.bf16.mxu1 %vm698_vm0, %v2066_v32 }
  0x4f   : > { %867 = vmatmul.mubr.bf16.gmra.mrb[16].mxu0 %v2068_v33  ;;  %995 = vmatmul.mubr.bf16.gmra.mrb[16].mxu1 %v2069_v34 }
  0x50   : > { %1824 = vmatprep.mubr.msk.bf16.mxu0 %vm698_vm0, %v2070_v35  ;;  %1840 = vmatprep.mubr.msk.bf16.mxu1 %vm698_vm0, %v2072_v36 }
  0x57   : > { %875 = vmatmul.mubr.bf16.gmra.mrb[20].mxu0 %v2074_v37  ;;  %1003 = vmatmul.mubr.bf16.gmra.mrb[20].mxu1 %v2075_v38 }
  0x58   : > { %1825 = vmatprep.mubr.msk.bf16.mxu0 %vm698_vm0, %v2076_v39  ;;  %1841 = vmatprep.mubr.msk.bf16.mxu1 %vm698_vm0, %v2078_v40 }
  0x5f   : > { %883 = vmatmul.mubr.bf16.gmra.mrb[24].mxu0 %v2080_v41  ;;  %1011 = vmatmul.mubr.bf16.gmra.mrb[24].mxu1 %v2081_v42 }
  0x60   : > { %1826 = vmatprep.mubr.msk.bf16.mxu0 %vm698_vm0, %v2082_v43  ;;  %1842 = vmatprep.mubr.msk.bf16.mxu1 %vm698_vm0, %v2084_v44 }
  0x67   : > { %891 = vmatmul.mubr.bf16.gmra.mrb[28].mxu0 %v2086_v45  ;;  %1019 = vmatmul.mubr.bf16.gmra.mrb[28].mxu1 %v2087_v46 }
  0x68   : > { %1827 = vmatprep.mubr.msk.bf16.mxu0 %vm698_vm0, %v2088_v47  ;;  %1843 = vmatprep.mubr.msk.bf16.mxu1 %vm698_vm0, %v2090_v48 }
  0x6f   : > { %899 = vmatmul.mubr.bf16.gmra.mrb[32].mxu0 %v2092_v49  ;;  %1027 = vmatmul.mubr.bf16.gmra.mrb[32].mxu1 %v2093_v50 }
  0x70   : > { %1828 = vmatprep.mubr.msk.bf16.mxu0 %vm698_vm0, %v2094_v51  ;;  %1844 = vmatprep.mubr.msk.bf16.mxu1 %vm698_vm0, %v2096_v52 }
  0x77   : > { %907 = vmatmul.mubr.bf16.gmra.mrb[36].mxu0 %v2098_v53  ;;  %1035 = vmatmul.mubr.bf16.gmra.mrb[36].mxu1 %v2099_v54 }
  0x78   : > { %1829 = vmatprep.mubr.msk.bf16.mxu0 %vm698_vm0, %v2100_v55  ;;  %1845 = vmatprep.mubr.msk.bf16.mxu1 %vm698_vm0, %v2102_v56 }
  0x7f   : > { %915 = vmatmul.mubr.bf16.gmra.mrb[40].mxu0 %v2104_v57  ;;  %1043 = vmatmul.mubr.bf16.gmra.mrb[40].mxu1 %v2105_v58 }
  0x80   : > { %1830 = vmatprep.mubr.msk.bf16.mxu0 %vm698_vm0, %v2106_v59  ;;  %1846 = vmatprep.mubr.msk.bf16.mxu1 %vm698_vm0, %v2108_v60 }
  0x87   : > { %923 = vmatmul.mubr.bf16.gmra.mrb[44].mxu0 %v2110_v61  ;;  %1051 = vmatmul.mubr.bf16.gmra.mrb[44].mxu1 %v2111_v62 }
  0x88   : > { %1831 = vmatprep.mubr.msk.bf16.mxu0 %vm698_vm0, %v2112_v63  ;;  %1847 = vmatprep.mubr.msk.bf16.mxu1 %vm698_vm0, %v2114_v0 }
  0x8f   : > { %931 = vmatmul.mubr.bf16.gmra.mrb[48].mxu0 %v2116_v1  ;;  %1059 = vmatmul.mubr.bf16.gmra.mrb[48].mxu1 %v2117_v2 }
  0x90   : > { %1832 = vmatprep.mubr.msk.bf16.mxu0 %vm698_vm0, %v2118_v3  ;;  %1848 = vmatprep.mubr.msk.bf16.mxu1 %vm698_vm0, %v2120_v4 }
  0x97   : > { %939 = vmatmul.mubr.bf16.gmra.mrb[52].mxu0 %v2122_v5  ;;  %1067 = vmatmul.mubr.bf16.gmra.mrb[52].mxu1 %v2123_v6 }
  0x98   : > { %1833 = vmatprep.mubr.msk.bf16.mxu0 %vm698_vm0, %v2124_v7  ;;  %1849 = vmatprep.mubr.msk.bf16.mxu1 %vm698_vm0, %v2126_v8 }
  0x9f   : > { %947 = vmatmul.mubr.bf16.gmra.mrb[56].mxu0 %v2128_v9  ;;  %1075 = vmatmul.mubr.bf16.gmra.mrb[56].mxu1 %v2129_v10 }
  0xa0   : > { %1834 = vmatprep.mubr.msk.bf16.mxu0 %vm698_vm0, %v2130_v11  ;;  %1850 = vmatprep.mubr.msk.bf16.mxu1 %vm698_vm0, %v2132_v12 }
  0xa7   : > { %955 = vmatmul.mubr.bf16.gmra.mrb[60].mxu0 %v2134_v13  ;;  %1083 = vmatmul.mubr.bf16.gmra.mrb[60].mxu1 %v2135_v14 }
 0x102   : > { %v836_v16 = vpop.f32.mrb[0].mxu0  ;;  %v964_v18 = vpop.f32.mrb[0].mxu1 }
 0x103   : > { %v1098_v19 = vmul.f32 %v2342_v15, %v836_v16  ;;  %v1130_v20 = vmul.f32 %v2342_v15, %v964_v18  ;;  %v838_v21 = vpop.f32.mrb[1].mxu0  ;;  %v966_v22 = vpop.f32.mrb[1].mxu1 }
 0x104   : > { %v839_v23 = vpop.f32.mrb[2].mxu0  ;;  %v967_v24 = vpop.f32.mrb[2].mxu1 }
 0x105   : > { %v1169_v25 = vadd.f32 %v2347_v17, %v1098_v19  ;;  %v1201_v26 = vadd.f32 %v2347_v17, %v1130_v20  ;;  %v1099_v27 = vmul.f32 %v2342_v15, %v839_v23  ;;  %v1131_v28 = vmul.f32 %v2342_v15, %v967_v24  ;;  %v841_v29 = vpop.f32.mrb[3].mxu0  ;;  %v969_v30 = vpop.f32.mrb[3].mxu1 }
 0x107   : > { %v1233_v31 = vmax.f32 %v1169_v25, 0.0  ;;  %v1265_v32 = vmax.f32 %v1201_v26, 0.0  ;;  %v1170_v33 = vadd.f32 %v2347_v17, %v1099_v27  ;;  %v1202_v34 = vadd.f32 %v2347_v17, %v1131_v28 }
 0x109   : > { %v1920_v35 = vpack.c.bf16 %v1233_v31, %v1233_v31  ;;  %v1952_v36 = vpack.c.bf16 %v1265_v32, %v1265_v32  ;;  %v1234_v37 = vmax.f32 %v1170_v33, 0.0  ;;  %v1266_v38 = vmax.f32 %v1202_v34, 0.0 }
 0x10a   : > { %v844_v39 = vpop.f32.mrb[4].mxu0  ;;  %v972_v40 = vpop.f32.mrb[4].mxu1 }
 0x10b   : > { %1554 = vst.msk [vmem:[%s2361_s25] sm:$0xf] %vm1553_vm3, %v1920_v35  ;;  %1586 = vst.msk [vmem:[%s2361_s25 + $0x80] sm:$0xf] %vm1553_vm3, %v1952_v36  ;;  %v1921_v41 = vpack.c.bf16 %v1234_v37, %v1234_v37  ;;  %v1953_v42 = vpack.c.bf16 %v1266_v38, %v1266_v38  ;;  %v1100_v43 = vmul.f32 %v2342_v15, %v844_v39  ;;  %v846_v45 = vpop.f32.mrb[5].mxu0  ;;  %v974_v46 = vpop.f32.mrb[5].mxu1 }
 0x10c   : > { %v1132_v44 = vmul.f32 %v2342_v15, %v972_v40  ;;  %v847_v47 = vpop.f32.mrb[6].mxu0  ;;  %v975_v48 = vpop.f32.mrb[6].mxu1 }
 0x10d   : > { %1555 = vst.msk [vmem:[%s2361_s25 + $0x4] sm:$0xf] %vm1553_vm3, %v1921_v41  ;;  %1587 = vst.msk [vmem:[%s2361_s25 + $0x84] sm:$0xf] %vm1553_vm3, %v1953_v42  ;;  %v1171_v49 = vadd.f32 %v2347_v17, %v1100_v43  ;;  %v1101_v51 = vmul.f32 %v2342_v15, %v847_v47  ;;  %v1133_v52 = vmul.f32 %v2342_v15, %v975_v48  ;;  %v849_v53 = vpop.f32.mrb[7].mxu0  ;;  %v977_v54 = vpop.f32.mrb[7].mxu1 }
 0x10e   : > { %v1203_v50 = vadd.f32 %v2347_v17, %v1132_v44 }
 0x10f   : > { %v1235_v55 = vmax.f32 %v1171_v49, 0.0  ;;  %v1172_v57 = vadd.f32 %v2347_v17, %v1101_v51  ;;  %v1204_v58 = vadd.f32 %v2347_v17, %v1133_v52 }
 0x110   : > { %v1267_v56 = vmax.f32 %v1203_v50, 0.0 }
 0x111   : > { %v1922_v59 = vpack.c.bf16 %v1235_v55, %v1235_v55  ;;  %v1236_v61 = vmax.f32 %v1172_v57, 0.0  ;;  %v1268_v62 = vmax.f32 %v1204_v58, 0.0 }
 0x112   : > { %v1954_v60 = vpack.c.bf16 %v1267_v56, %v1267_v56  ;;  %v852_v63 = vpop.f32.mrb[8].mxu0  ;;  %v980_v0 = vpop.f32.mrb[8].mxu1 }
 0x113   : > { %1556 = vst.msk [vmem:[%s2361_s25 + $0x8] sm:$0xf] %vm1553_vm3, %v1922_v59  ;;  %v1923_v1 = vpack.c.bf16 %v1236_v61, %v1236_v61  ;;  %v1955_v2 = vpack.c.bf16 %v1268_v62, %v1268_v62  ;;  %v1102_v3 = vmul.f32 %v2342_v15, %v852_v63  ;;  %v1134_v4 = vmul.f32 %v2342_v15, %v980_v0  ;;  %v854_v5 = vpop.f32.mrb[9].mxu0  ;;  %v982_v6 = vpop.f32.mrb[9].mxu1 }
 0x114   : > { %1588 = vst.msk [vmem:[%s2361_s25 + $0x88] sm:$0xf] %vm1553_vm3, %v1954_v60  ;;  %v855_v7 = vpop.f32.mrb[10].mxu0  ;;  %v983_v8 = vpop.f32.mrb[10].mxu1 }
 0x115   : > { %1557 = vst.msk [vmem:[%s2361_s25 + $0xc] sm:$0xf] %vm1553_vm3, %v1923_v1  ;;  %1589 = vst.msk [vmem:[%s2361_s25 + $0x8c] sm:$0xf] %vm1553_vm3, %v1955_v2  ;;  %v1173_v9 = vadd.f32 %v2347_v17, %v1102_v3  ;;  %v1205_v10 = vadd.f32 %v2347_v17, %v1134_v4  ;;  %v1103_v11 = vmul.f32 %v2342_v15, %v855_v7  ;;  %v857_v13 = vpop.f32.mrb[11].mxu0  ;;  %v985_v14 = vpop.f32.mrb[11].mxu1 }
 0x116   : > { %v1135_v12 = vmul.f32 %v2342_v15, %v983_v8 }
 0x117   : > { %v1237_v16 = vmax.f32 %v1173_v9, 0.0  ;;  %v1269_v18 = vmax.f32 %v1205_v10, 0.0  ;;  %v1174_v19 = vadd.f32 %v2347_v17, %v1103_v11 }
 0x118   : > { %v1206_v20 = vadd.f32 %v2347_v17, %v1135_v12 }
 0x119   : > { %v1924_v21 = vpack.c.bf16 %v1237_v16, %v1237_v16  ;;  %v1956_v22 = vpack.c.bf16 %v1269_v18, %v1269_v18  ;;  %v1238_v23 = vmax.f32 %v1174_v19, 0.0 }
 0x11a   : > { %v1270_v24 = vmax.f32 %v1206_v20, 0.0  ;;  %v860_v25 = vpop.f32.mrb[12].mxu0  ;;  %v988_v26 = vpop.f32.mrb[12].mxu1 }
 0x11b   : > { %1558 = vst.msk [vmem:[%s2361_s25 + $0x10] sm:$0xf] %vm1553_vm3, %v1924_v21  ;;  %1590 = vst.msk [vmem:[%s2361_s25 + $0x90] sm:$0xf] %vm1553_vm3, %v1956_v22  ;;  %v1925_v27 = vpack.c.bf16 %v1238_v23, %v1238_v23  ;;  %v1104_v29 = vmul.f32 %v2342_v15, %v860_v25  ;;  %v1136_v30 = vmul.f32 %v2342_v15, %v988_v26  ;;  %v862_v31 = vpop.f32.mrb[13].mxu0  ;;  %v990_v32 = vpop.f32.mrb[13].mxu1 }
 0x11c   : > { %v1957_v28 = vpack.c.bf16 %v1270_v24, %v1270_v24  ;;  %v863_v33 = vpop.f32.mrb[14].mxu0  ;;  %v991_v34 = vpop.f32.mrb[14].mxu1 }
 0x11d   : > { %1559 = vst.msk [vmem:[%s2361_s25 + $0x14] sm:$0xf] %vm1553_vm3, %v1925_v27  ;;  %v1175_v35 = vadd.f32 %v2347_v17, %v1104_v29  ;;  %v1207_v36 = vadd.f32 %v2347_v17, %v1136_v30  ;;  %v1105_v37 = vmul.f32 %v2342_v15, %v863_v33  ;;  %v1137_v38 = vmul.f32 %v2342_v15, %v991_v34  ;;  %v865_v39 = vpop.f32.mrb[15].mxu0  ;;  %v993_v40 = vpop.f32.mrb[15].mxu1 }
 0x11e   : > { %1591 = vst.msk [vmem:[%s2361_s25 + $0x94] sm:$0xf] %vm1553_vm3, %v1957_v28 }
 0x11f   : > { %v1239_v41 = vmax.f32 %v1175_v35, 0.0  ;;  %v1271_v42 = vmax.f32 %v1207_v36, 0.0  ;;  %v1176_v43 = vadd.f32 %v2347_v17, %v1105_v37  ;;  %v1208_v44 = vadd.f32 %v2347_v17, %v1137_v38 }
 0x121   : > { %v1926_v45 = vpack.c.bf16 %v1239_v41, %v1239_v41  ;;  %v1958_v46 = vpack.c.bf16 %v1271_v42, %v1271_v42  ;;  %v1240_v47 = vmax.f32 %v1176_v43, 0.0  ;;  %v1272_v48 = vmax.f32 %v1208_v44, 0.0 }
 0x122   : > { %v868_v49 = vpop.f32.mrb[16].mxu0  ;;  %v996_v50 = vpop.f32.mrb[16].mxu1 }
 0x123   : > { %1560 = vst.msk [vmem:[%s2361_s25 + $0x18] sm:$0xf] %vm1553_vm3, %v1926_v45  ;;  %1592 = vst.msk [vmem:[%s2361_s25 + $0x98] sm:$0xf] %vm1553_vm3, %v1958_v46  ;;  %v1927_v51 = vpack.c.bf16 %v1240_v47, %v1240_v47  ;;  %v1959_v52 = vpack.c.bf16 %v1272_v48, %v1272_v48  ;;  %v1106_v53 = vmul.f32 %v2342_v15, %v868_v49  ;;  %v870_v55 = vpop.f32.mrb[17].mxu0  ;;  %v998_v56 = vpop.f32.mrb[17].mxu1 }
 0x124   : > { %v1138_v54 = vmul.f32 %v2342_v15, %v996_v50  ;;  %v871_v57 = vpop.f32.mrb[18].mxu0  ;;  %v999_v58 = vpop.f32.mrb[18].mxu1 }
 0x125   : > { %1561 = vst.msk [vmem:[%s2361_s25 + $0x1c] sm:$0xf] %vm1553_vm3, %v1927_v51  ;;  %1593 = vst.msk [vmem:[%s2361_s25 + $0x9c] sm:$0xf] %vm1553_vm3, %v1959_v52  ;;  %v1177_v59 = vadd.f32 %v2347_v17, %v1106_v53  ;;  %v1107_v61 = vmul.f32 %v2342_v15, %v871_v57  ;;  %v1139_v62 = vmul.f32 %v2342_v15, %v999_v58  ;;  %v873_v63 = vpop.f32.mrb[19].mxu0  ;;  %v1001_v0 = vpop.f32.mrb[19].mxu1 }
 0x126   : > { %v1209_v60 = vadd.f32 %v2347_v17, %v1138_v54 }
 0x127   : > { %v1241_v1 = vmax.f32 %v1177_v59, 0.0  ;;  %v1178_v3 = vadd.f32 %v2347_v17, %v1107_v61  ;;  %v1210_v4 = vadd.f32 %v2347_v17, %v1139_v62 }
 0x128   : > { %v1273_v2 = vmax.f32 %v1209_v60, 0.0 }
 0x129   : > { %v1928_v5 = vpack.c.bf16 %v1241_v1, %v1241_v1  ;;  %v1242_v7 = vmax.f32 %v1178_v3, 0.0  ;;  %v1274_v8 = vmax.f32 %v1210_v4, 0.0 }
 0x12a   : > { %v1960_v6 = vpack.c.bf16 %v1273_v2, %v1273_v2  ;;  %v876_v9 = vpop.f32.mrb[20].mxu0  ;;  %v1004_v10 = vpop.f32.mrb[20].mxu1 }
 0x12b   : > { %1562 = vst.msk [vmem:[%s2361_s25 + $0x20] sm:$0xf] %vm1553_vm3, %v1928_v5  ;;  %v1929_v11 = vpack.c.bf16 %v1242_v7, %v1242_v7  ;;  %v1961_v12 = vpack.c.bf16 %v1274_v8, %v1274_v8  ;;  %v1108_v13 = vmul.f32 %v2342_v15, %v876_v9  ;;  %v1140_v14 = vmul.f32 %v2342_v15, %v1004_v10  ;;  %v878_v16 = vpop.f32.mrb[21].mxu0  ;;  %v1006_v18 = vpop.f32.mrb[21].mxu1 }
 0x12c   : > { %1594 = vst.msk [vmem:[%s2361_s25 + $0xa0] sm:$0xf] %vm1553_vm3, %v1960_v6  ;;  %v879_v19 = vpop.f32.mrb[22].mxu0  ;;  %v1007_v20 = vpop.f32.mrb[22].mxu1 }
 0x12d   : > { %1563 = vst.msk [vmem:[%s2361_s25 + $0x24] sm:$0xf] %vm1553_vm3, %v1929_v11  ;;  %1595 = vst.msk [vmem:[%s2361_s25 + $0xa4] sm:$0xf] %vm1553_vm3, %v1961_v12  ;;  %v1179_v21 = vadd.f32 %v2347_v17, %v1108_v13  ;;  %v1211_v22 = vadd.f32 %v2347_v17, %v1140_v14  ;;  %v1109_v23 = vmul.f32 %v2342_v15, %v879_v19  ;;  %v881_v25 = vpop.f32.mrb[23].mxu0  ;;  %v1009_v26 = vpop.f32.mrb[23].mxu1 }
 0x12e   : > { %v1141_v24 = vmul.f32 %v2342_v15, %v1007_v20 }
 0x12f   : > { %v1243_v27 = vmax.f32 %v1179_v21, 0.0  ;;  %v1275_v28 = vmax.f32 %v1211_v22, 0.0  ;;  %v1180_v29 = vadd.f32 %v2347_v17, %v1109_v23 }
 0x130   : > { %v1212_v30 = vadd.f32 %v2347_v17, %v1141_v24 }
 0x131   : > { %v1930_v31 = vpack.c.bf16 %v1243_v27, %v1243_v27  ;;  %v1962_v32 = vpack.c.bf16 %v1275_v28, %v1275_v28  ;;  %v1244_v33 = vmax.f32 %v1180_v29, 0.0 }
 0x132   : > { %v1276_v34 = vmax.f32 %v1212_v30, 0.0  ;;  %v884_v35 = vpop.f32.mrb[24].mxu0  ;;  %v1012_v36 = vpop.f32.mrb[24].mxu1 }
 0x133   : > { %1564 = vst.msk [vmem:[%s2361_s25 + $0x28] sm:$0xf] %vm1553_vm3, %v1930_v31  ;;  %1596 = vst.msk [vmem:[%s2361_s25 + $0xa8] sm:$0xf] %vm1553_vm3, %v1962_v32  ;;  %v1931_v37 = vpack.c.bf16 %v1244_v33, %v1244_v33  ;;  %v1110_v39 = vmul.f32 %v2342_v15, %v884_v35  ;;  %v1142_v40 = vmul.f32 %v2342_v15, %v1012_v36  ;;  %v886_v41 = vpop.f32.mrb[25].mxu0  ;;  %v1014_v42 = vpop.f32.mrb[25].mxu1 }
 0x134   : > { %v1963_v38 = vpack.c.bf16 %v1276_v34, %v1276_v34  ;;  %v887_v43 = vpop.f32.mrb[26].mxu0  ;;  %v1015_v44 = vpop.f32.mrb[26].mxu1 }
 0x135   : > { %1565 = vst.msk [vmem:[%s2361_s25 + $0x2c] sm:$0xf] %vm1553_vm3, %v1931_v37  ;;  %v1181_v45 = vadd.f32 %v2347_v17, %v1110_v39  ;;  %v1213_v46 = vadd.f32 %v2347_v17, %v1142_v40  ;;  %v1111_v47 = vmul.f32 %v2342_v15, %v887_v43  ;;  %v1143_v48 = vmul.f32 %v2342_v15, %v1015_v44  ;;  %v889_v49 = vpop.f32.mrb[27].mxu0  ;;  %v1017_v50 = vpop.f32.mrb[27].mxu1 }
 0x136   : > { %1597 = vst.msk [vmem:[%s2361_s25 + $0xac] sm:$0xf] %vm1553_vm3, %v1963_v38 }
 0x137   : > { %v1245_v51 = vmax.f32 %v1181_v45, 0.0  ;;  %v1277_v52 = vmax.f32 %v1213_v46, 0.0  ;;  %v1182_v53 = vadd.f32 %v2347_v17, %v1111_v47  ;;  %v1214_v54 = vadd.f32 %v2347_v17, %v1143_v48 }
 0x139   : > { %v1932_v55 = vpack.c.bf16 %v1245_v51, %v1245_v51  ;;  %v1964_v56 = vpack.c.bf16 %v1277_v52, %v1277_v52  ;;  %v1246_v57 = vmax.f32 %v1182_v53, 0.0  ;;  %v1278_v58 = vmax.f32 %v1214_v54, 0.0 }
 0x13a   : > { %v892_v59 = vpop.f32.mrb[28].mxu0  ;;  %v1020_v60 = vpop.f32.mrb[28].mxu1 }
 0x13b   : > { %1566 = vst.msk [vmem:[%s2361_s25 + $0x30] sm:$0xf] %vm1553_vm3, %v1932_v55  ;;  %1598 = vst.msk [vmem:[%s2361_s25 + $0xb0] sm:$0xf] %vm1553_vm3, %v1964_v56  ;;  %v1933_v61 = vpack.c.bf16 %v1246_v57, %v1246_v57  ;;  %v1965_v62 = vpack.c.bf16 %v1278_v58, %v1278_v58  ;;  %v1112_v63 = vmul.f32 %v2342_v15, %v892_v59  ;;  %v894_v1 = vpop.f32.mrb[29].mxu0  ;;  %v1022_v2 = vpop.f32.mrb[29].mxu1 }
 0x13c   : > { %v1144_v0 = vmul.f32 %v2342_v15, %v1020_v60  ;;  %v895_v3 = vpop.f32.mrb[30].mxu0  ;;  %v1023_v4 = vpop.f32.mrb[30].mxu1 }
 0x13d   : > { %1567 = vst.msk [vmem:[%s2361_s25 + $0x34] sm:$0xf] %vm1553_vm3, %v1933_v61  ;;  %1599 = vst.msk [vmem:[%s2361_s25 + $0xb4] sm:$0xf] %vm1553_vm3, %v1965_v62  ;;  %v1183_v5 = vadd.f32 %v2347_v17, %v1112_v63  ;;  %v1113_v7 = vmul.f32 %v2342_v15, %v895_v3  ;;  %v1145_v8 = vmul.f32 %v2342_v15, %v1023_v4  ;;  %v897_v9 = vpop.f32.mrb[31].mxu0  ;;  %v1025_v10 = vpop.f32.mrb[31].mxu1 }
 0x13e   : > { %v1215_v6 = vadd.f32 %v2347_v17, %v1144_v0 }
 0x13f   : > { %v1247_v11 = vmax.f32 %v1183_v5, 0.0  ;;  %v1184_v13 = vadd.f32 %v2347_v17, %v1113_v7  ;;  %v1216_v14 = vadd.f32 %v2347_v17, %v1145_v8 }
 0x140   : > { %v1279_v12 = vmax.f32 %v1215_v6, 0.0 }
 0x141   : > { %v1934_v16 = vpack.c.bf16 %v1247_v11, %v1247_v11  ;;  %v1248_v19 = vmax.f32 %v1184_v13, 0.0  ;;  %v1280_v20 = vmax.f32 %v1216_v14, 0.0 }
 0x142   : > { %v1966_v18 = vpack.c.bf16 %v1279_v12, %v1279_v12  ;;  %v900_v21 = vpop.f32.mrb[32].mxu0  ;;  %v1028_v22 = vpop.f32.mrb[32].mxu1 }
 0x143   : > { %1568 = vst.msk [vmem:[%s2361_s25 + $0x38] sm:$0xf] %vm1553_vm3, %v1934_v16  ;;  %v1935_v23 = vpack.c.bf16 %v1248_v19, %v1248_v19  ;;  %v1967_v24 = vpack.c.bf16 %v1280_v20, %v1280_v20  ;;  %v1114_v25 = vmul.f32 %v2342_v15, %v900_v21  ;;  %v1146_v26 = vmul.f32 %v2342_v15, %v1028_v22  ;;  %v902_v27 = vpop.f32.mrb[33].mxu0  ;;  %v1030_v28 = vpop.f32.mrb[33].mxu1 }
 0x144   : > { %1600 = vst.msk [vmem:[%s2361_s25 + $0xb8] sm:$0xf] %vm1553_vm3, %v1966_v18  ;;  %v903_v29 = vpop.f32.mrb[34].mxu0  ;;  %v1031_v30 = vpop.f32.mrb[34].mxu1 }
 0x145   : > { %1569 = vst.msk [vmem:[%s2361_s25 + $0x3c] sm:$0xf] %vm1553_vm3, %v1935_v23  ;;  %1601 = vst.msk [vmem:[%s2361_s25 + $0xbc] sm:$0xf] %vm1553_vm3, %v1967_v24  ;;  %v1185_v31 = vadd.f32 %v2347_v17, %v1114_v25  ;;  %v1217_v32 = vadd.f32 %v2347_v17, %v1146_v26  ;;  %v1115_v33 = vmul.f32 %v2342_v15, %v903_v29  ;;  %v905_v35 = vpop.f32.mrb[35].mxu0  ;;  %v1033_v36 = vpop.f32.mrb[35].mxu1 }
 0x146   : > { %v1147_v34 = vmul.f32 %v2342_v15, %v1031_v30 }
 0x147   : > { %v1249_v37 = vmax.f32 %v1185_v31, 0.0  ;;  %v1281_v38 = vmax.f32 %v1217_v32, 0.0  ;;  %v1186_v39 = vadd.f32 %v2347_v17, %v1115_v33 }
 0x148   : > { %v1218_v40 = vadd.f32 %v2347_v17, %v1147_v34 }
 0x149   : > { %v1936_v41 = vpack.c.bf16 %v1249_v37, %v1249_v37  ;;  %v1968_v42 = vpack.c.bf16 %v1281_v38, %v1281_v38  ;;  %v1250_v43 = vmax.f32 %v1186_v39, 0.0 }
 0x14a   : > { %v1282_v44 = vmax.f32 %v1218_v40, 0.0  ;;  %v908_v45 = vpop.f32.mrb[36].mxu0  ;;  %v1036_v46 = vpop.f32.mrb[36].mxu1 }
 0x14b   : > { %1570 = vst.msk [vmem:[%s2361_s25 + $0x40] sm:$0xf] %vm1553_vm3, %v1936_v41  ;;  %1602 = vst.msk [vmem:[%s2361_s25 + $0xc0] sm:$0xf] %vm1553_vm3, %v1968_v42  ;;  %v1937_v47 = vpack.c.bf16 %v1250_v43, %v1250_v43  ;;  %v1116_v49 = vmul.f32 %v2342_v15, %v908_v45  ;;  %v1148_v50 = vmul.f32 %v2342_v15, %v1036_v46  ;;  %v910_v51 = vpop.f32.mrb[37].mxu0  ;;  %v1038_v52 = vpop.f32.mrb[37].mxu1 }
 0x14c   : > { %v1969_v48 = vpack.c.bf16 %v1282_v44, %v1282_v44  ;;  %v911_v53 = vpop.f32.mrb[38].mxu0  ;;  %v1039_v54 = vpop.f32.mrb[38].mxu1 }
 0x14d   : > { %1571 = vst.msk [vmem:[%s2361_s25 + $0x44] sm:$0xf] %vm1553_vm3, %v1937_v47  ;;  %v1187_v55 = vadd.f32 %v2347_v17, %v1116_v49  ;;  %v1219_v56 = vadd.f32 %v2347_v17, %v1148_v50  ;;  %v1117_v57 = vmul.f32 %v2342_v15, %v911_v53  ;;  %v1149_v58 = vmul.f32 %v2342_v15, %v1039_v54  ;;  %v913_v59 = vpop.f32.mrb[39].mxu0  ;;  %v1041_v60 = vpop.f32.mrb[39].mxu1 }
 0x14e   : > { %1603 = vst.msk [vmem:[%s2361_s25 + $0xc4] sm:$0xf] %vm1553_vm3, %v1969_v48 }
 0x14f   : > { %v1251_v61 = vmax.f32 %v1187_v55, 0.0  ;;  %v1283_v62 = vmax.f32 %v1219_v56, 0.0  ;;  %v1188_v63 = vadd.f32 %v2347_v17, %v1117_v57  ;;  %v1220_v0 = vadd.f32 %v2347_v17, %v1149_v58 }
 0x151   : > { %v1938_v1 = vpack.c.bf16 %v1251_v61, %v1251_v61  ;;  %v1970_v2 = vpack.c.bf16 %v1283_v62, %v1283_v62  ;;  %v1252_v3 = vmax.f32 %v1188_v63, 0.0  ;;  %v1284_v4 = vmax.f32 %v1220_v0, 0.0 }
 0x152   : > { %v916_v5 = vpop.f32.mrb[40].mxu0  ;;  %v1044_v6 = vpop.f32.mrb[40].mxu1 }
 0x153   : > { %1572 = vst.msk [vmem:[%s2361_s25 + $0x48] sm:$0xf] %vm1553_vm3, %v1938_v1  ;;  %1604 = vst.msk [vmem:[%s2361_s25 + $0xc8] sm:$0xf] %vm1553_vm3, %v1970_v2  ;;  %v1939_v7 = vpack.c.bf16 %v1252_v3, %v1252_v3  ;;  %v1971_v8 = vpack.c.bf16 %v1284_v4, %v1284_v4  ;;  %v1118_v9 = vmul.f32 %v2342_v15, %v916_v5  ;;  %v918_v11 = vpop.f32.mrb[41].mxu0  ;;  %v1046_v12 = vpop.f32.mrb[41].mxu1 }
 0x154   : > { %v1150_v10 = vmul.f32 %v2342_v15, %v1044_v6  ;;  %v919_v13 = vpop.f32.mrb[42].mxu0  ;;  %v1047_v14 = vpop.f32.mrb[42].mxu1 }
 0x155   : > { %1573 = vst.msk [vmem:[%s2361_s25 + $0x4c] sm:$0xf] %vm1553_vm3, %v1939_v7  ;;  %1605 = vst.msk [vmem:[%s2361_s25 + $0xcc] sm:$0xf] %vm1553_vm3, %v1971_v8  ;;  %v1189_v16 = vadd.f32 %v2347_v17, %v1118_v9  ;;  %v1119_v19 = vmul.f32 %v2342_v15, %v919_v13  ;;  %v1151_v20 = vmul.f32 %v2342_v15, %v1047_v14  ;;  %v921_v21 = vpop.f32.mrb[43].mxu0  ;;  %v1049_v22 = vpop.f32.mrb[43].mxu1 }
 0x156   : > { %v1221_v18 = vadd.f32 %v2347_v17, %v1150_v10 }
 0x157   : > { %v1253_v23 = vmax.f32 %v1189_v16, 0.0  ;;  %v1190_v25 = vadd.f32 %v2347_v17, %v1119_v19  ;;  %v1222_v26 = vadd.f32 %v2347_v17, %v1151_v20 }
 0x158   : > { %v1285_v24 = vmax.f32 %v1221_v18, 0.0 }
 0x159   : > { %v1940_v27 = vpack.c.bf16 %v1253_v23, %v1253_v23  ;;  %v1254_v29 = vmax.f32 %v1190_v25, 0.0  ;;  %v1286_v30 = vmax.f32 %v1222_v26, 0.0 }
 0x15a   : > { %v1972_v28 = vpack.c.bf16 %v1285_v24, %v1285_v24  ;;  %v924_v31 = vpop.f32.mrb[44].mxu0  ;;  %v1052_v32 = vpop.f32.mrb[44].mxu1 }
 0x15b   : > { %1574 = vst.msk [vmem:[%s2361_s25 + $0x50] sm:$0xf] %vm1553_vm3, %v1940_v27  ;;  %v1941_v33 = vpack.c.bf16 %v1254_v29, %v1254_v29  ;;  %v1973_v34 = vpack.c.bf16 %v1286_v30, %v1286_v30  ;;  %v1120_v35 = vmul.f32 %v2342_v15, %v924_v31  ;;  %v1152_v36 = vmul.f32 %v2342_v15, %v1052_v32  ;;  %v926_v37 = vpop.f32.mrb[45].mxu0  ;;  %v1054_v38 = vpop.f32.mrb[45].mxu1 }
 0x15c   : > { %1606 = vst.msk [vmem:[%s2361_s25 + $0xd0] sm:$0xf] %vm1553_vm3, %v1972_v28  ;;  %v927_v39 = vpop.f32.mrb[46].mxu0  ;;  %v1055_v40 = vpop.f32.mrb[46].mxu1 }
 0x15d   : > { %1575 = vst.msk [vmem:[%s2361_s25 + $0x54] sm:$0xf] %vm1553_vm3, %v1941_v33  ;;  %1607 = vst.msk [vmem:[%s2361_s25 + $0xd4] sm:$0xf] %vm1553_vm3, %v1973_v34  ;;  %v1191_v41 = vadd.f32 %v2347_v17, %v1120_v35  ;;  %v1223_v42 = vadd.f32 %v2347_v17, %v1152_v36  ;;  %v1121_v43 = vmul.f32 %v2342_v15, %v927_v39  ;;  %v929_v45 = vpop.f32.mrb[47].mxu0  ;;  %v1057_v46 = vpop.f32.mrb[47].mxu1 }
 0x15e   : > { %v1153_v44 = vmul.f32 %v2342_v15, %v1055_v40 }
 0x15f   : > { %v1255_v47 = vmax.f32 %v1191_v41, 0.0  ;;  %v1287_v48 = vmax.f32 %v1223_v42, 0.0  ;;  %v1192_v49 = vadd.f32 %v2347_v17, %v1121_v43 }
 0x160   : > { %v1224_v50 = vadd.f32 %v2347_v17, %v1153_v44 }
 0x161   : > { %v1942_v51 = vpack.c.bf16 %v1255_v47, %v1255_v47  ;;  %v1974_v52 = vpack.c.bf16 %v1287_v48, %v1287_v48  ;;  %v1256_v53 = vmax.f32 %v1192_v49, 0.0 }
 0x162   : > { %v1288_v54 = vmax.f32 %v1224_v50, 0.0  ;;  %v932_v55 = vpop.f32.mrb[48].mxu0  ;;  %v1060_v56 = vpop.f32.mrb[48].mxu1 }
 0x163   : > { %1576 = vst.msk [vmem:[%s2361_s25 + $0x58] sm:$0xf] %vm1553_vm3, %v1942_v51  ;;  %1608 = vst.msk [vmem:[%s2361_s25 + $0xd8] sm:$0xf] %vm1553_vm3, %v1974_v52  ;;  %v1943_v57 = vpack.c.bf16 %v1256_v53, %v1256_v53  ;;  %v1122_v59 = vmul.f32 %v2342_v15, %v932_v55  ;;  %v1154_v60 = vmul.f32 %v2342_v15, %v1060_v56  ;;  %v934_v61 = vpop.f32.mrb[49].mxu0  ;;  %v1062_v62 = vpop.f32.mrb[49].mxu1 }
 0x164   : > { %v1975_v58 = vpack.c.bf16 %v1288_v54, %v1288_v54  ;;  %v935_v63 = vpop.f32.mrb[50].mxu0  ;;  %v1063_v0 = vpop.f32.mrb[50].mxu1 }
 0x165   : > { %1577 = vst.msk [vmem:[%s2361_s25 + $0x5c] sm:$0xf] %vm1553_vm3, %v1943_v57  ;;  %v1193_v1 = vadd.f32 %v2347_v17, %v1122_v59  ;;  %v1225_v2 = vadd.f32 %v2347_v17, %v1154_v60  ;;  %v1123_v3 = vmul.f32 %v2342_v15, %v935_v63  ;;  %v1155_v4 = vmul.f32 %v2342_v15, %v1063_v0  ;;  %v937_v5 = vpop.f32.mrb[51].mxu0  ;;  %v1065_v6 = vpop.f32.mrb[51].mxu1 }
 0x166   : > { %1609 = vst.msk [vmem:[%s2361_s25 + $0xdc] sm:$0xf] %vm1553_vm3, %v1975_v58 }
 0x167   : > { %v1257_v7 = vmax.f32 %v1193_v1, 0.0  ;;  %v1289_v8 = vmax.f32 %v1225_v2, 0.0  ;;  %v1194_v9 = vadd.f32 %v2347_v17, %v1123_v3  ;;  %v1226_v10 = vadd.f32 %v2347_v17, %v1155_v4 }
 0x169   : > { %v1944_v11 = vpack.c.bf16 %v1257_v7, %v1257_v7  ;;  %v1976_v12 = vpack.c.bf16 %v1289_v8, %v1289_v8  ;;  %v1258_v13 = vmax.f32 %v1194_v9, 0.0  ;;  %v1290_v14 = vmax.f32 %v1226_v10, 0.0 }
 0x16a   : > { %v940_v16 = vpop.f32.mrb[52].mxu0  ;;  %v1068_v18 = vpop.f32.mrb[52].mxu1 }
 0x16b   : > { %1578 = vst.msk [vmem:[%s2361_s25 + $0x60] sm:$0xf] %vm1553_vm3, %v1944_v11  ;;  %1610 = vst.msk [vmem:[%s2361_s25 + $0xe0] sm:$0xf] %vm1553_vm3, %v1976_v12  ;;  %v1945_v19 = vpack.c.bf16 %v1258_v13, %v1258_v13  ;;  %v1977_v20 = vpack.c.bf16 %v1290_v14, %v1290_v14  ;;  %v1124_v21 = vmul.f32 %v2342_v15, %v940_v16  ;;  %v942_v23 = vpop.f32.mrb[53].mxu0  ;;  %v1070_v24 = vpop.f32.mrb[53].mxu1 }
 0x16c   : > { %v1156_v22 = vmul.f32 %v2342_v15, %v1068_v18  ;;  %v943_v25 = vpop.f32.mrb[54].mxu0  ;;  %v1071_v26 = vpop.f32.mrb[54].mxu1 }
 0x16d   : > { %1579 = vst.msk [vmem:[%s2361_s25 + $0x64] sm:$0xf] %vm1553_vm3, %v1945_v19  ;;  %1611 = vst.msk [vmem:[%s2361_s25 + $0xe4] sm:$0xf] %vm1553_vm3, %v1977_v20  ;;  %v1195_v27 = vadd.f32 %v2347_v17, %v1124_v21  ;;  %v1125_v29 = vmul.f32 %v2342_v15, %v943_v25  ;;  %v1157_v30 = vmul.f32 %v2342_v15, %v1071_v26  ;;  %v945_v31 = vpop.f32.mrb[55].mxu0  ;;  %v1073_v32 = vpop.f32.mrb[55].mxu1 }
 0x16e   : > { %v1227_v28 = vadd.f32 %v2347_v17, %v1156_v22 }
 0x16f   : > { %v1259_v33 = vmax.f32 %v1195_v27, 0.0  ;;  %v1196_v35 = vadd.f32 %v2347_v17, %v1125_v29  ;;  %v1228_v36 = vadd.f32 %v2347_v17, %v1157_v30 }
 0x170   : > { %v1291_v34 = vmax.f32 %v1227_v28, 0.0 }
 0x171   : > { %v1946_v37 = vpack.c.bf16 %v1259_v33, %v1259_v33  ;;  %v1260_v39 = vmax.f32 %v1196_v35, 0.0  ;;  %v1292_v40 = vmax.f32 %v1228_v36, 0.0 }
 0x172   : > { %v1978_v38 = vpack.c.bf16 %v1291_v34, %v1291_v34  ;;  %v948_v41 = vpop.f32.mrb[56].mxu0  ;;  %v1076_v42 = vpop.f32.mrb[56].mxu1 }
 0x173   : > { %1580 = vst.msk [vmem:[%s2361_s25 + $0x68] sm:$0xf] %vm1553_vm3, %v1946_v37  ;;  %v1947_v43 = vpack.c.bf16 %v1260_v39, %v1260_v39  ;;  %v1979_v44 = vpack.c.bf16 %v1292_v40, %v1292_v40  ;;  %v1126_v45 = vmul.f32 %v2342_v15, %v948_v41  ;;  %v1158_v46 = vmul.f32 %v2342_v15, %v1076_v42  ;;  %v950_v47 = vpop.f32.mrb[57].mxu0  ;;  %v1078_v48 = vpop.f32.mrb[57].mxu1 }
 0x174   : > { %1612 = vst.msk [vmem:[%s2361_s25 + $0xe8] sm:$0xf] %vm1553_vm3, %v1978_v38  ;;  %v951_v49 = vpop.f32.mrb[58].mxu0  ;;  %v1079_v50 = vpop.f32.mrb[58].mxu1 }
 0x175   : > { %1581 = vst.msk [vmem:[%s2361_s25 + $0x6c] sm:$0xf] %vm1553_vm3, %v1947_v43  ;;  %1613 = vst.msk [vmem:[%s2361_s25 + $0xec] sm:$0xf] %vm1553_vm3, %v1979_v44  ;;  %v1197_v51 = vadd.f32 %v2347_v17, %v1126_v45  ;;  %v1229_v52 = vadd.f32 %v2347_v17, %v1158_v46  ;;  %v1127_v53 = vmul.f32 %v2342_v15, %v951_v49  ;;  %v953_v55 = vpop.f32.mrb[59].mxu0  ;;  %v1081_v56 = vpop.f32.mrb[59].mxu1 }
 0x176   : > { %v1159_v54 = vmul.f32 %v2342_v15, %v1079_v50 }
 0x177   : > { %v1261_v57 = vmax.f32 %v1197_v51, 0.0  ;;  %v1293_v58 = vmax.f32 %v1229_v52, 0.0  ;;  %v1198_v59 = vadd.f32 %v2347_v17, %v1127_v53 }
 0x178   : > { %v1230_v60 = vadd.f32 %v2347_v17, %v1159_v54 }
 0x179   : > { %v1948_v61 = vpack.c.bf16 %v1261_v57, %v1261_v57  ;;  %v1980_v62 = vpack.c.bf16 %v1293_v58, %v1293_v58  ;;  %v1262_v63 = vmax.f32 %v1198_v59, 0.0 }
 0x17a   : > { %v1294_v0 = vmax.f32 %v1230_v60, 0.0  ;;  %v956_v1 = vpop.f32.mrb[60].mxu0  ;;  %v1084_v2 = vpop.f32.mrb[60].mxu1 }
 0x17b   : > { %1582 = vst.msk [vmem:[%s2361_s25 + $0x70] sm:$0xf] %vm1553_vm3, %v1948_v61  ;;  %1614 = vst.msk [vmem:[%s2361_s25 + $0xf0] sm:$0xf] %vm1553_vm3, %v1980_v62  ;;  %v1949_v3 = vpack.c.bf16 %v1262_v63, %v1262_v63  ;;  %v1128_v5 = vmul.f32 %v2342_v15, %v956_v1  ;;  %v1160_v6 = vmul.f32 %v2342_v15, %v1084_v2  ;;  %v958_v7 = vpop.f32.mrb[61].mxu0  ;;  %v1086_v8 = vpop.f32.mrb[61].mxu1 }
 0x17c   : > { %v1981_v4 = vpack.c.bf16 %v1294_v0, %v1294_v0  ;;  %v959_v9 = vpop.f32.mrb[62].mxu0  ;;  %v1087_v10 = vpop.f32.mrb[62].mxu1 }
 0x17d   : > { %1583 = vst.msk [vmem:[%s2361_s25 + $0x74] sm:$0xf] %vm1553_vm3, %v1949_v3  ;;  %v1199_v11 = vadd.f32 %v2347_v17, %v1128_v5  ;;  %v1231_v12 = vadd.f32 %v2347_v17, %v1160_v6  ;;  %v1129_v13 = vmul.f32 %v2342_v15, %v959_v9  ;;  %v1161_v14 = vmul.f32 %v2342_v15, %v1087_v10  ;;  %v961_v16 = vpop.f32.mrb[63].mxu0  ;;  %v1089_v18 = vpop.f32.mrb[63].mxu1 }
 0x17e   : > { %1615 = vst.msk [vmem:[%s2361_s25 + $0xf4] sm:$0xf] %vm1553_vm3, %v1981_v4 }
 0x17f   : > { %v1263_v19 = vmax.f32 %v1199_v11, 0.0  ;;  %v1295_v20 = vmax.f32 %v1231_v12, 0.0  ;;  %v1200_v21 = vadd.f32 %v2347_v17, %v1129_v13  ;;  %v1232_v22 = vadd.f32 %v2347_v17, %v1161_v14 }
 0x181   : > { %v1950_v23 = vpack.c.bf16 %v1263_v19, %v1263_v19  ;;  %v1982_v24 = vpack.c.bf16 %v1295_v20, %v1295_v20  ;;  %v1264_v25 = vmax.f32 %v1200_v21, 0.0  ;;  %v1296_v26 = vmax.f32 %v1232_v22, 0.0 }
 0x183   : > { %1584 = vst.msk [vmem:[%s2361_s25 + $0x78] sm:$0xf] %vm1553_vm3, %v1950_v23  ;;  %1616 = vst.msk [vmem:[%s2361_s25 + $0xf8] sm:$0xf] %vm1553_vm3, %v1982_v24  ;;  %v1951_v27 = vpack.c.bf16 %v1264_v25, %v1264_v25  ;;  %v1983_v28 = vpack.c.bf16 %v1296_v26, %v1296_v26 }
 0x185   : > { %1585 = vst.msk [vmem:[%s2361_s25 + $0x7c] sm:$0xf] %vm1553_vm3, %v1951_v27  ;;  %1617 = vst.msk [vmem:[%s2361_s25 + $0xfc] sm:$0xf] %vm1553_vm3, %v1983_v28 }
 0x186 PF: > { %s14_s17 = sadd.s32 1, %s2158_s17   ;;  %s2625_s15 = smov %s2154_s16 }
 0x187   : > { %p11_p5 = scmp.ge.s32.totalorder %s14_s17, 6   ;;  %s2626_s16 = smov %s2628_s18 }
 0x189   :  { %13 = sbr.rel (!%p11_p5) target bundleno = 2 (0x2), region = 75 }

</bundles_post_ra>
